<compile_context>
chip_gen: v5e
topology: v5e:2x2
jax: 0.10.0
libtpu: 0.0.40
codegen_flags: <defaults>
</compile_context>

<pallas_src>
import jax
import jax.numpy as jnp
from jax.experimental import pallas as pl
from jax.experimental.pallas import tpu as pltpu


def _round_up(x, m):
    return ((x + m - 1) // m) * m


def _cdiv(a, b):
    return -(-a // b)


# Inputs smaller than this (lane-padded bytes) use a fused XLA concatenate:
# fixed kernel dispatch cost dominates at that size.
_MIN_PALLAS_BYTES = 512 * 1024


def _vmem_capacity_bytes():
    """Physical VMEM per TensorCore; conservative fallback if unqueryable."""
    try:
        cap = getattr(pltpu.get_tpu_info(), "vmem_capacity_bytes", None)
        if cap:
            return int(cap)
    except Exception:
        pass
    return 64 * 1024 * 1024  # v7x per-TC (smallest current generation)


def _xla_fallback(x, value):
    col = jnp.full(x.shape[:-1] + (1,), value, dtype=x.dtype)
    return jnp.concatenate([col, x], axis=-1)


def _add_dim_kernel(value_ref, x_ref, o_ref):
    # value_ref: SMEM scalar (shape (1,)); x_ref: (TR, D); o_ref: (TR, D+1).
    # Build the whole output tile in registers and write it with ONE unmasked
    # full-block store: the +1 lane shift of x lands on the XLU slot, and the
    # store slot issues a single full-width vst per lane tile instead of two
    # masked partial stores.
    tr = o_ref.shape[0]
    col = jnp.full((tr, 1), value_ref[0], dtype=o_ref.dtype)
    o_ref[...] = jnp.concatenate([col, x_ref[...]], axis=-1)


def add_dim_to_start(x, value, *, force_pallas=False):
    """Prepend a constant column of `value` along the last axis of x."""
    original_shape = x.shape
    D = int(original_shape[-1])
    R = 1
    for s in original_shape[:-1]:
        R *= int(s)
    out_shape = original_shape[:-1] + (D + 1,)

    # Degenerate shapes: nothing for a kernel to do.
    if R == 0 or D == 0:
        return _xla_fallback(x, value)

    itemsize = jnp.dtype(x.dtype).itemsize
    lanes_in = _round_up(D, 128)
    lanes_out = _round_up(D + 1, 128)

    # Small-input fast path (the fused XLA pad is strictly faster there).
    if not force_pallas and R * max(lanes_in, lanes_out) * itemsize < _MIN_PALLAS_BYTES:
        return _xla_fallback(x, value)

    # Sublane packing: 8 rows/vreg for 32-bit, 16 for 16-bit, 32 for 8-bit.
    pack = {4: 8, 2: 16, 1: 32}.get(itemsize, 8)

    # Row tile budgeted against lane-padded VMEM cost: one pipeline slot holds
    # TR * (rup(D,128) + rup(D+1,128)) * itemsize bytes (input + output tile);
    # double-buffering doubles that.  ~8 MiB per slot keeps tiles >= 512 rows
    # for D up to ~2K f32 (past the measured 85% HBM-roofline knee) while the
    # explicit vmem_limit below keeps every generation's scoped limit safe.
    vmem_cap = _vmem_capacity_bytes()
    budget_bytes = min(8 * 1024 * 1024, vmem_cap // 8)
    per_row_bytes = (lanes_in + lanes_out) * itemsize
    tr = max(pack, min(2048, budget_bytes // per_row_bytes))
    tr = (tr // pack) * pack
    tr = min(tr, _round_up(R, pack))

    num_tiles = _cdiv(R, tr)
    # Ensure >= 2 row blocks whenever possible so the "parallel" grid axis
    # actually feeds both TensorCores on v7x (no-op on single-TC v5e/v6e).
    if num_tiles == 1 and R >= 2 * pack:
        tr = max(pack, _round_up(_cdiv(R, 2), pack))
        num_tiles = _cdiv(R, tr)

    # Ragged R: the last row block is partial; Pallas only writes back its
    # valid rows, so no wrapper-side pad / slice and no extra HBM traffic.
    x2d = x.reshape(R, D)

    # `value` as an SMEM scalar (scalar prefetch) -> no retrace when it
    # changes.  Like jnp.full / torch.full this casts to x.dtype.
    value_arr = jnp.asarray(
        [value],
        dtype=jnp.float32 if jnp.issubdtype(x.dtype, jnp.floating) else jnp.int32,
    )

    footprint = 2 * tr * per_row_bytes  # double-buffered in + out tiles
    vmem_limit = int(min(vmem_cap // 2, max(16 * 1024 * 1024, 2 * footprint)))

    out2d = pl.pallas_call(
        _add_dim_kernel,
        out_shape=jax.ShapeDtypeStruct((R, D + 1), x.dtype),
        grid_spec=pltpu.PrefetchScalarGridSpec(
            num_scalar_prefetch=1,
            grid=(num_tiles,),
            # index_maps receive the scalar-prefetch ref as a trailing arg.
            in_specs=[pl.BlockSpec((tr, D), lambda i, v: (i, 0))],
            out_specs=pl.BlockSpec((tr, D + 1), lambda i, v: (i, 0)),
        ),
        compiler_params=pltpu.CompilerParams(
            dimension_semantics=("parallel",),
            vmem_limit_bytes=vmem_limit,
        ),
    )(value_arr, x2d)

    return out2d.reshape(out_shape)

# TODO(synk): for very large, lane-aligned D an HBM->HBM DMA-only payload path
# (memory_space=pl.ANY; make_async_copy(x_hbm.at[rows, :], out_hbm.at[rows,
# pl.ds(1, D)], sem) plus a tiny VMEM->HBM DMA for the constant column) would
# skip the VMEM round-trip and the lane shift entirely; unnecessary here.


if __name__ == "__main__":
    key = jax.random.PRNGKey(0)
    value = 1.5  # the module's __init__ constant

    def ref_fn(x):
        return jnp.concatenate(
            [jnp.full(x.shape[:-1] + (1,), value, dtype=x.dtype), x], axis=-1
        )

    # 1) Canonical small NCHW-style input; force the Pallas path so the
    #    kernel itself is exercised (2 row tiles even at this size).
    x = jax.random.normal(key, (2, 4, 16, 16), dtype=jnp.float32)
    out = jax.block_until_ready(add_dim_to_start(x, value, force_pallas=True))
    assert out.shape == (2, 4, 16, 17), out.shape
    assert out.dtype == x.dtype
    assert jnp.allclose(out, ref_fn(x)), "mismatch vs reference (small)"

    # 2) Ragged row count (105 rows -> 2 tiles, partial last block handled
    #    in-kernel, no wrapper pad/slice).
    x2 = jax.random.normal(jax.random.PRNGKey(1), (3, 5, 7, 16), dtype=jnp.float32)
    out2 = jax.block_until_ready(add_dim_to_start(x2, value, force_pallas=True))
    assert out2.shape == (3, 5, 7, 17), out2.shape
    assert jnp.allclose(out2, ref_fn(x2)), "mismatch vs reference (ragged R)"

    # 3) Lane-aligned D on the natural (non-forced) Pallas path: 2 row tiles
    #    with a partial tail.
    x3 = jax.random.normal(jax.random.PRNGKey(2), (2, 300, 256), dtype=jnp.float32)
    out3 = jax.block_until_ready(add_dim_to_start(x3, value))
    assert out3.shape == (2, 300, 257), out3.shape
    assert jnp.allclose(out3, ref_fn(x3)), "mismatch vs reference (aligned D)"

    # 4) Small-input fast path (fused XLA concatenate).
    out4 = jax.block_until_ready(add_dim_to_start(x, value))
    assert jnp.allclose(out4, ref_fn(x)), "mismatch vs reference (fast path)"

    print("KERNEL_OK")
</pallas_src>

<mosaic_0001>
module attributes {stable_mosaic.version = 11 : i64} {
  func.func @_add_dim_kernel(%arg0: i32, %arg1: memref<1xf32, #tpu.memory_space<smem>>, %arg2: memref<64x16xf32, #tpu.memory_space<vmem>>, %arg3: memref<64x17xf32, #tpu.memory_space<vmem>>) attributes {dimension_semantics = [#tpu.dimension_semantics<parallel>], iteration_bounds = array<i64: 2>, scalar_prefetch = 1 : i64, scratch_operands = 0 : i64, tpu.core_type = #tpu.core_type<tc>, window_params = [{transform_indices = @transform_0, window_bounds = array<i64: 64, 16>}, {transform_indices = @transform_1, window_bounds = array<i64: 64, 17>}]} {
    %c0 = arith.constant 0 : index
    %0 = memref.load %arg1[%c0] : memref<1xf32, #tpu.memory_space<smem>>
    %1 = vector.broadcast %0 : f32 to vector<64x1xf32>
    %c0_0 = arith.constant 0 : index
    %c0_1 = arith.constant 0 : index
    %2 = vector.load %arg2[%c0_0, %c0_1] : memref<64x16xf32, #tpu.memory_space<vmem>>, vector<64x16xf32>
    %3 = tpu.concatenate %1, %2 in 1 : vector<64x1xf32>, vector<64x16xf32> -> vector<64x17xf32>
    %c0_2 = arith.constant 0 : index
    %c0_3 = arith.constant 0 : index
    %4 = vector.load %arg3[%c0_2, %c0_3] : memref<64x17xf32, #tpu.memory_space<vmem>>, vector<64x17xf32>
    tpu.vector_store %arg3[%c0_2, %c0_3], %3 {strides = array<i32>} : memref<64x17xf32, #tpu.memory_space<vmem>>, vector<64x17xf32>,
    return
  }
  func.func @transform_0(%arg0: i32, %arg1: memref<1xf32, #tpu.memory_space<smem>>) -> (i32, i32) {
    %c0_i32 = arith.constant 0 : i32
    %c0_i32_0 = arith.constant 0 : i32
    return %arg0, %c0_i32 : i32, i32
  }
  func.func @transform_1(%arg0: i32, %arg1: memref<1xf32, #tpu.memory_space<smem>>) -> (i32, i32) {
    %c0_i32 = arith.constant 0 : i32
    %c0_i32_0 = arith.constant 0 : i32
    return %arg0, %c0_i32 : i32, i32
  }
}

</mosaic_0001>

<bundles_post_ra>
// kernel: tpu_custom_call.1
= control target key start
LH: loop header
LB: loop body
LE: loop exit
PB: predicated region body
PF: predicated region fallthrough
CT: control target
= control target key end

     0   :  { %s285_s11 = smov 0   ;;  %s318_s0 = inlined_call_operand.<no memory space> [shape: f32[1], index: 0, kind: input, shape index: {}]   ;;  %s319_s1 = inlined_call_operand.vmem [shape: f32[128,16], index: 1, kind: input, shape index: {}]   ;;  %s320_s2 = inlined_call_operand.vmem [shape: f32[128,17], index: 2, kind: output, shape index: {}]  }
   0x1   :  { %7 = sst [smem:[#allocation3]] %s318_s0 }
   0x2 LB: > { %s238_s12 = sadd.s32 4294967295, %s264_s11   ;;  %p242_p0 = scmp.ge.s32.totalorder %s264_s11, 1  ;;  %s264_s11 = sphi %s285_s11, %s13_s11  }
   0x3   : > { %p90_p1 = scmp.lt.s32.totalorder %s264_s11, 3 }
   0x5   : > { %p91_p2 = pnand %p242_p0, %p90_p1 }
   0x6   : > { %s243_s13 = sshll.u32 (!%p91_p2), %s238_s12, 3  ;;  %s266_s17 = smov (!%p91_p2), 1  }
   0x7   : > { %94 = sbr.rel (%p91_p2) target bundleno = 150 (0x96), region = 24  ;;  %p111_p3 = scmp.lt.s32.totalorder (!%p91_p2), %s243_s13, 15 }
   0x8   : > { %s122_s18 = sld [smem:[#allocation3]] (!%p91_p2) }
   0xc   : > { %s322_s13 = smov (!%p111_p3, %s243_s13), 15  ;;  %vm164_vm0 = vcmask 7168   ;;  %vm173_vm1 = vcmask 138240  }
   0xd   : > { %s244_s14 = sshll.u32 %s322_s13, 3 }
   0xe   : > { %s114_s16 = scalar_lea.vmem %s319_s1, %s244_s14  ;;  %v123_v8 = vstv %s122_s18  ;;  %s120_s21 = scalar_lea.vmem %s320_s2, %s244_s14 }
   0xf   : > { %v126_v0 = vld [vmem:[%s114_s16 + $0x10] sm:$0xff]  ;;  %v124_v1 = vld [vmem:[%s114_s16] sm:$0xff]  ;;  %v127_v3 = vld [vmem:[%s114_s16 + $0x18] sm:$0xff] }
  0x10   : > { %144 = vrot.lane.b32.xlu1 %v126_v0, %s266_s17  ;;  %140 = vrot.lane.b32.xlu0 %v124_v1, %s266_s17  ;;  %v128_v2 = vld [vmem:[%s114_s16 + $0x20] sm:$0xff]  ;;  %v125_v4 = vld [vmem:[%s114_s16 + $0x8] sm:$0xff] }
  0x11   : > { %148 = vrot.lane.b32.xlu2 %v128_v2, %s266_s17  ;;  %v129_v5 = vld [vmem:[%s114_s16 + $0x28] sm:$0xff]  ;;  %v131_v6 = vld [vmem:[%s114_s16 + $0x38] sm:$0xff]  ;;  %v130_v7 = vld [vmem:[%s114_s16 + $0x30] sm:$0xff] }
  0x18   : > { %146 = vrot.lane.b32.xlu1 %v127_v3, %s266_s17  ;;  %142 = vrot.lane.b32.xlu0 %v125_v4, %s266_s17 }
  0x19   : > { %150 = vrot.lane.b32.xlu2 %v129_v5, %s266_s17 }
  0x20   : > { %154 = vrot.lane.b32.xlu1 %v131_v6, %s266_s17  ;;  %152 = vrot.lane.b32.xlu0 %v130_v7, %s266_s17 }
  0x6b   : > { %v149_v9 = vpop.permute.xlu2 %148 }
  0x6c   : > { %v169_v10 = vsel %vm164_vm0, %v123_v8, %v149_v9 }
  0x6d   : > { %178 = vst.msk [vmem:[%s120_s21 + $0x20] sm:$0xff] %vm173_vm1, %v169_v10 }
  0x73   : > { %v151_v11 = vpop.permute.xlu2 %150 }
  0x74   : > { %v170_v12 = vsel %vm164_vm0, %v123_v8, %v151_v11 }
  0x75   : > { %179 = vst.msk [vmem:[%s120_s21 + $0x28] sm:$0xff] %vm173_vm1, %v170_v12 }
  0x82   : > { %v145_v13 = vpop.permute.xlu1 %144  ;;  %v141_v14 = vpop.permute.xlu0 %140 }
  0x83   : > { %v167_v15 = vsel %vm164_vm0, %v123_v8, %v145_v13  ;;  %v165_v16 = vsel %vm164_vm0, %v123_v8, %v141_v14 }
  0x84   : > { %176 = vst.msk [vmem:[%s120_s21 + $0x10] sm:$0xff] %vm173_vm1, %v167_v15 }
  0x85   : > { %174 = vst.msk [vmem:[%s120_s21] sm:$0xff] %vm173_vm1, %v165_v16 }
  0x8a   : > { %v147_v17 = vpop.permute.xlu1 %146  ;;  %v143_v18 = vpop.permute.xlu0 %142 }
  0x8b   : > { %v168_v19 = vsel %vm164_vm0, %v123_v8, %v147_v17  ;;  %v166_v20 = vsel %vm164_vm0, %v123_v8, %v143_v18 }
  0x8c   : > { %177 = vst.msk [vmem:[%s120_s21 + $0x18] sm:$0xff] %vm173_vm1, %v168_v19 }
  0x8d   : > { %175 = vst.msk [vmem:[%s120_s21 + $0x8] sm:$0xff] %vm173_vm1, %v166_v20 }
  0x92   : > { %v155_v21 = vpop.permute.xlu1 %154  ;;  %v153_v22 = vpop.permute.xlu0 %152 }
  0x93   : > { %v172_v23 = vsel %vm164_vm0, %v123_v8, %v155_v21  ;;  %v171_v24 = vsel %vm164_vm0, %v123_v8, %v153_v22 }
  0x94   : > { %181 = vst.msk [vmem:[%s120_s21 + $0x38] sm:$0xff] %vm173_vm1, %v172_v23 }
  0x95   : > { %180 = vst.msk [vmem:[%s120_s21 + $0x30] sm:$0xff] %vm173_vm1, %v171_v24 }
  0x96 PF: > { %s13_s11 = sadd.s32 1, %s264_s11  }
  0x97   : > { %p10_p4 = scmp.ge.s32.totalorder %s13_s11, 4  }
  0x99   :  { %12 = sbr.rel (!%p10_p4) target bundleno = 2 (0x2), region = 54 }

</bundles_post_ra>
